<compile_context>
chip_gen: v7x
topology: tpu7x:2x2x1
jax: 0.10.0
libtpu: 0.0.40
codegen_flags: <defaults>
</compile_context>

<pallas_src>
import jax
import jax.numpy as jnp
from jax.experimental import pallas as pl
from jax.experimental.pallas import tpu as pltpu

# ---------------- configuration (args) ----------------
N_AGENTS = 20                      # fixed to 20 amino-acid types by the module
FEA_NUM = 8                        # embedding feature size
STATE_DIM = N_AGENTS * FEA_NUM     # args.global_state_dim = 160
EMBED_DIM = 32                     # args.mixing_embed_dim
HYPERNET_EMBED = 64                # args.hypernet_embed
BATCH = 8
AA_LEN = 16

# packed-layer layout constants
L1_OUT = EMBED_DIM + HYPERNET_EMBED + HYPERNET_EMBED + EMBED_DIM   # 192: [b1|h1|hf|hv]
W1_COLS = N_AGENTS * EMBED_DIM                                     # 640
L2_OUT = W1_COLS + EMBED_DIM + 1                                   # 673: [w1|wf|v]


# ---------------- Pallas kernel: the QMIX mixer ----------------
def qmixer_kernel(states_ref, qs_ref, w1_ref, b1_ref, w2_ref, b2_ref,
                  expand_ref, reduce_ref, qtot_ref):
    f32 = jnp.float32
    bf16 = jnp.bfloat16

    s = states_ref[...].astype(bf16)              # (TB, 160) bf16 for MXU
    q = qs_ref[...]                               # (TB, 20)  f32

    # ---- fused first layers of all 4 state-consuming MLPs: one MXU push ----
    #   cat = s @ [Wb1 | W1a | Wfa | Wva] + [bb1 | b1a | bfa | bva]   (TB, 192) f32
    cat = jnp.dot(s, w1_ref[...], preferred_element_type=f32) + b1_ref[...]
    b1 = cat[:, 0:EMBED_DIM]                      # hyper_b_1(s), no activation
    h = jnp.maximum(cat, 0.0).astype(bf16)        # ReLU (b1 lanes hit zero rows below)

    # ---- fused second layers (block-diagonal packed weight): one MXU push ----
    #   out2 = relu(cat) @ blockdiag(W1b, Wfb, Wvb) + [b1b | bfb | bvb]  (TB, 673) f32
    out2 = jnp.dot(h, w2_ref[...], preferred_element_type=f32) + b2_ref[...]
    w1 = jnp.abs(out2[:, 0:W1_COLS])                              # (TB, 640) |hyper_w_1|
    wf = jnp.abs(out2[:, W1_COLS:W1_COLS + EMBED_DIM])            # (TB, 32)  |hyper_w_final|
    v = out2[:, W1_COLS + EMBED_DIM:W1_COLS + EMBED_DIM + 1]      # (TB, 1)   V(s)

    # ---- per-sample agent contraction as expand/reduce MXU matmuls ----
    # expand[a, a*E+e] = 1 ; reduce[a*E+e, e] = 1  (0/1 resident constants, f32 exact)
    q_exp = jnp.dot(q, expand_ref[...], preferred_element_type=f32)         # (TB, 640)
    pre = jnp.dot(q_exp * w1, reduce_ref[...], preferred_element_type=f32) + b1  # (TB, 32)
    neg = jnp.exp(jnp.minimum(pre, 0.0)) - 1.0
    hidden = jnp.where(pre > 0, pre, neg)                          # ELU(alpha=1)

    # y = bmm(hidden, w_final) + V(s)
    y = jnp.sum(hidden * wf, axis=1, keepdims=True) + v            # (TB, 1)
    qtot_ref[...] = y.astype(qtot_ref.dtype)


def make_expand_reduce():
    """0/1 matrices so that the per-agent contraction becomes two matmuls."""
    a = jnp.arange(N_AGENTS)
    col = jnp.arange(W1_COLS)
    expand = (col[None, :] // EMBED_DIM == a[:, None]).astype(jnp.float32)   # (20, 640)
    e = jnp.arange(EMBED_DIM)
    reduce_m = (col[:, None] % EMBED_DIM == e[None, :]).astype(jnp.float32)  # (640, 32)
    return expand, reduce_m


def qmixer_mix(global_states, agent_qs, packed):
    """Runs the mixing network in a Pallas kernel.  Returns q_tot (B, 1, 1)."""
    bs = global_states.shape[0]
    TB = bs
    for cand in (512, 256, 128, 64, 32, 16, 8):   # biggest batch tile (multiple of 8)
        if bs % cand == 0:
            TB = cand
            break
    grid = (bs // TB,)
    w_l1, b_l1, w_l2, b_l2, expand, reduce_m = packed

    q_tot = pl.pallas_call(
        qmixer_kernel,
        out_shape=jax.ShapeDtypeStruct((bs, 1), jnp.float32),
        grid=grid,
        in_specs=[
            pl.BlockSpec((TB, STATE_DIM), lambda i: (i, 0)),
            pl.BlockSpec((TB, N_AGENTS), lambda i: (i, 0)),
            pl.BlockSpec(w_l1.shape, lambda i: (0, 0)),   # weights stay resident
            pl.BlockSpec(b_l1.shape, lambda i: (0, 0)),
            pl.BlockSpec(w_l2.shape, lambda i: (0, 0)),
            pl.BlockSpec(b_l2.shape, lambda i: (0, 0)),
            pl.BlockSpec(expand.shape, lambda i: (0, 0)),
            pl.BlockSpec(reduce_m.shape, lambda i: (0, 0)),
        ],
        out_specs=pl.BlockSpec((TB, 1), lambda i: (i, 0)),
        compiler_params=pltpu.CompilerParams(dimension_semantics=("parallel",)),
    )(global_states, agent_qs, w_l1, b_l1, w_l2, b_l2, expand, reduce_m)
    return q_tot.reshape(bs, 1, 1)


# ---------------- parameter packing (done once, outside the kernel) ----------------
def pack_params(params):
    (w1a, b1a, w1b, b1b, wb1, bb1, wfa, bfa, wfb, bfb, wva, bva, wvb, bvb) = params
    f32 = jnp.float32
    # layer 1 columns: [b1 (32) | h1 (64) | hf (64) | hv (32)]
    w_l1 = jnp.concatenate([wb1, w1a, wfa, wva], axis=1)            # (160, 192)
    b_l1 = jnp.concatenate([bb1, b1a, bfa, bva], axis=1)            # (1, 192)
    # layer 2: block-diagonal, rows aligned with layer-1 column order;
    # output columns: [w1 (640) | wf (32) | v (1)]
    z = lambda r, c: jnp.zeros((r, c), f32)
    rows_b1 = z(EMBED_DIM, L2_OUT)                                  # b1 passthrough -> 0
    rows_h1 = jnp.concatenate([w1b, z(HYPERNET_EMBED, EMBED_DIM), z(HYPERNET_EMBED, 1)], 1)
    rows_hf = jnp.concatenate([z(HYPERNET_EMBED, W1_COLS), wfb, z(HYPERNET_EMBED, 1)], 1)
    rows_hv = jnp.concatenate([z(EMBED_DIM, W1_COLS), z(EMBED_DIM, EMBED_DIM), wvb], 1)
    w_l2 = jnp.concatenate([rows_b1, rows_h1, rows_hf, rows_hv], axis=0)   # (192, 673)
    b_l2 = jnp.concatenate([b1b, bfb, bvb], axis=1)                        # (1, 673)
    expand, reduce_m = make_expand_reduce()
    # bf16 weights for the MXU (f32 accumulate in-kernel); biases / 0-1 maps stay f32.
    return (w_l1.astype(jnp.bfloat16), b_l1,
            w_l2.astype(jnp.bfloat16), b_l2,
            expand, reduce_m)


# ---------------- plain-JAX glue (the PyTorch per-element loops, vectorized) ----------------
def prepare_inputs(qs_wt, aa_wt, aa_mut, agent_mask, mask, mutation_mask,
                   emb_wt, emb_mut):
    # select_prepare_q
    valid = jnp.logical_and(agent_mask, mask)                       # (B, L)
    sel_idx = jnp.where(mutation_mask, aa_mut, aa_wt)               # (B, L)
    q_gather = jnp.take_along_axis(qs_wt, sel_idx[..., None], axis=2)[..., 0]
    q_sele = jnp.where(valid, q_gather, 0.0)                        # (B, L)

    validf = valid[..., None].astype(jnp.float32)
    oh_wt = jax.nn.one_hot(aa_wt, N_AGENTS, dtype=jnp.float32) * validf    # (B, L, 20)
    oh_mut = jax.nn.one_hot(aa_mut, N_AGENTS, dtype=jnp.float32) * validf  # (B, L, 20)

    # reshape_q : scatter-add q_sele into 20 bins keyed by wt amino-acid id
    agent_qs = jnp.einsum('bl,blk->bk', q_sele, oh_wt)              # (B, 20)

    # prepare_global_state : per-bin mean of wt+mut embeddings
    sum_emb = (jnp.einsum('blk,blf->bkf', oh_wt, emb_wt)
               + jnp.einsum('blk,blf->bkf', oh_mut, emb_mut))       # (B, 20, F)
    nums = oh_wt.sum(axis=1) + oh_mut.sum(axis=1)                   # (B, 20)
    denom = jnp.maximum(nums, 1.0)[..., None]
    gs = jnp.where(nums[..., None] > 0, sum_emb / denom, 0.0)
    global_states = gs.reshape(gs.shape[0], STATE_DIM)              # (B, 160)
    return q_sele, agent_qs, global_states


@jax.jit
def qmixer_forward(qs_wt, aa_wt, aa_mut, agent_mask, mask, mutation_mask,
                   emb_wt, emb_mut, packed):
    q_sele_wt, agent_qs, global_states = prepare_inputs(
        qs_wt, aa_wt, aa_mut, agent_mask, mask, mutation_mask, emb_wt, emb_mut)
    q_tot = qmixer_mix(global_states, agent_qs, packed)
    return q_tot, q_sele_wt


# ---------------- pure-JAX references for the mixer (sanity check) ----------------
def mix_ref(states, agent_qs, params):
    """Exact f32 module semantics."""
    (w1a, b1a, w1b, b1b, wb1, bb1, wfa, bfa, wfb, bfb, wva, bva, wvb, bvb) = params
    bs = states.shape[0]
    h1 = jax.nn.relu(states @ w1a + b1a)
    w1 = jnp.abs(h1 @ w1b + b1b).reshape(bs, N_AGENTS, EMBED_DIM)
    b1 = (states @ wb1 + bb1).reshape(bs, 1, EMBED_DIM)
    hidden = jax.nn.elu(jnp.einsum('ba,bae->be', agent_qs, w1)[:, None, :] + b1)
    hf = jax.nn.relu(states @ wfa + bfa)
    wf = jnp.abs(hf @ wfb + bfb).reshape(bs, EMBED_DIM, 1)
    hv = jax.nn.relu(states @ wva + bva)
    v = (hv @ wvb + bvb).reshape(bs, 1, 1)
    y = jnp.einsum('bqe,beo->bqo', hidden, wf) + v
    return y.reshape(bs, -1, 1)


def mix_ref_bf16(states, agent_qs, params):
    """Mirrors the kernel's bf16 rounding of MXU operands (f32 accumulation)."""
    (w1a, b1a, w1b, b1b, wb1, bb1, wfa, bfa, wfb, bfb, wva, bva, wvb, bvb) = params
    r = lambda x: x.astype(jnp.bfloat16).astype(jnp.float32)
    mm = lambda a, b: jnp.dot(a, b, precision=jax.lax.Precision.HIGHEST)
    bs = states.shape[0]
    s = r(states)
    h1 = r(jax.nn.relu(mm(s, r(w1a)) + b1a))
    hf = r(jax.nn.relu(mm(s, r(wfa)) + bfa))
    hv = r(jax.nn.relu(mm(s, r(wva)) + bva))
    b1 = mm(s, r(wb1)) + bb1
    w1 = jnp.abs(mm(h1, r(w1b)) + b1b).reshape(bs, N_AGENTS, EMBED_DIM)
    wf = jnp.abs(mm(hf, r(wfb)) + bfb)
    v = mm(hv, r(wvb)) + bvb
    hidden = jax.nn.elu(
        jnp.einsum('ba,bae->be', agent_qs, w1,
                   precision=jax.lax.Precision.HIGHEST) + b1)
    y = jnp.sum(hidden * wf, axis=1, keepdims=True) + v
    return y.reshape(bs, 1, 1)


# ---------------- deterministic parameter init ----------------
def init_params(key):
    def lin(k, fan_in, fan_out):
        kw, kb = jax.random.split(k)
        w = jax.random.normal(kw, (fan_in, fan_out), jnp.float32) * 0.1
        b = jax.random.normal(kb, (1, fan_out), jnp.float32) * 0.1
        return w, b

    ks = jax.random.split(key, 7)
    w1a, b1a = lin(ks[0], STATE_DIM, HYPERNET_EMBED)
    w1b, b1b = lin(ks[1], HYPERNET_EMBED, EMBED_DIM * N_AGENTS)
    wb1, bb1 = lin(ks[2], STATE_DIM, EMBED_DIM)
    wfa, bfa = lin(ks[3], STATE_DIM, HYPERNET_EMBED)
    wfb, bfb = lin(ks[4], HYPERNET_EMBED, EMBED_DIM)
    wva, bva = lin(ks[5], STATE_DIM, EMBED_DIM)
    wvb, bvb = lin(ks[6], EMBED_DIM, 1)
    return (w1a, b1a, w1b, b1b, wb1, bb1, wfa, bfa, wfb, bfb, wva, bva, wvb, bvb)


if __name__ == "__main__":
    key = jax.random.PRNGKey(0)
    kp, k1, k2, k3, k4, k5, k6, k7, k8 = jax.random.split(key, 9)

    params = init_params(kp)
    packed = pack_params(params)

    qs_wt = jax.random.normal(k1, (BATCH, AA_LEN, N_AGENTS), jnp.float32)
    aa_wt = jax.random.randint(k2, (BATCH, AA_LEN), 0, N_AGENTS, jnp.int32)
    aa_mut = jax.random.randint(k3, (BATCH, AA_LEN), 0, N_AGENTS, jnp.int32)
    agent_mask = jax.random.bernoulli(k4, 0.8, (BATCH, AA_LEN))
    mask = jax.random.bernoulli(k5, 0.9, (BATCH, AA_LEN))
    mutation_mask = jax.random.bernoulli(k6, 0.3, (BATCH, AA_LEN))
    emb_wt = jax.random.normal(k7, (BATCH, AA_LEN, FEA_NUM), jnp.float32)
    emb_mut = jax.random.normal(k8, (BATCH, AA_LEN, FEA_NUM), jnp.float32)

    q_tot, q_sele_wt = qmixer_forward(
        qs_wt, aa_wt, aa_mut, agent_mask, mask, mutation_mask,
        emb_wt, emb_mut, packed)
    q_tot = jax.block_until_ready(q_tot)
    q_sele_wt = jax.block_until_ready(q_sele_wt)

    # sanity checks against pure-JAX references
    _, agent_qs, global_states = prepare_inputs(
        qs_wt, aa_wt, aa_mut, agent_mask, mask, mutation_mask, emb_wt, emb_mut)
    q_ref_bf16 = mix_ref_bf16(global_states, agent_qs, params)   # same bf16 rounding
    q_ref_f32 = mix_ref(global_states, agent_qs, params)         # exact module semantics

    assert q_tot.shape == (BATCH, 1, 1)
    assert q_sele_wt.shape == (BATCH, AA_LEN)
    # tight check vs the bf16-rounded reference (kernel logic correctness)
    assert jnp.allclose(q_tot, q_ref_bf16, rtol=2e-2, atol=2e-2)
    # loose check vs full-f32 module semantics (bf16 weight quantization only)
    assert jnp.allclose(q_tot, q_ref_f32, rtol=2e-1, atol=5e-1)

    print("KERNEL_OK")
</pallas_src>

<mosaic_0001>
module attributes {stable_mosaic.version = 11 : i64} {
  func.func @qmixer_kernel(%arg0: i32, %arg1: memref<8x160xf32, #tpu.memory_space<vmem>>, %arg2: memref<8x20xf32, #tpu.memory_space<vmem>>, %arg3: memref<160x192xbf16, #tpu.memory_space<vmem>>, %arg4: memref<1x192xf32, #tpu.memory_space<vmem>>, %arg5: memref<192x673xbf16, #tpu.memory_space<vmem>>, %arg6: memref<1x673xf32, #tpu.memory_space<vmem>>, %arg7: memref<20x640xf32, #tpu.memory_space<vmem>>, %arg8: memref<640x32xf32, #tpu.memory_space<vmem>>, %arg9: memref<8x1xf32, #tpu.memory_space<vmem>>) attributes {dimension_semantics = [#tpu.dimension_semantics<parallel>], iteration_bounds = array<i64: 1>, scalar_prefetch = 0 : i64, scratch_operands = 0 : i64, tpu.core_type = #tpu.core_type<tc>, window_params = [{transform_indices = @transform_0, window_bounds = array<i64: 8, 160>}, {transform_indices = @transform_1, window_bounds = array<i64: 8, 20>}, {pipeline_mode = #tpu.pipeline_mode<synchronous>, transform_indices = @transform_2, window_bounds = array<i64: 160, 192>}, {pipeline_mode = #tpu.pipeline_mode<synchronous>, transform_indices = @transform_3, window_bounds = array<i64: 1, 192>}, {pipeline_mode = #tpu.pipeline_mode<synchronous>, transform_indices = @transform_4, window_bounds = array<i64: 192, 673>}, {pipeline_mode = #tpu.pipeline_mode<synchronous>, transform_indices = @transform_5, window_bounds = array<i64: 1, 673>}, {pipeline_mode = #tpu.pipeline_mode<synchronous>, transform_indices = @transform_6, window_bounds = array<i64: 20, 640>}, {pipeline_mode = #tpu.pipeline_mode<synchronous>, transform_indices = @transform_7, window_bounds = array<i64: 640, 32>}, {transform_indices = @transform_8, window_bounds = array<i64: 8, 1>}]} {
    %c0 = arith.constant 0 : index
    %c0_0 = arith.constant 0 : index
    %0 = vector.load %arg1[%c0, %c0_0] : memref<8x160xf32, #tpu.memory_space<vmem>>, vector<8x160xf32>
    %1 = arith.truncf %0 : vector<8x160xf32> to vector<8x160xbf16>
    %c0_1 = arith.constant 0 : index
    %c0_2 = arith.constant 0 : index
    %2 = vector.load %arg2[%c0_1, %c0_2] : memref<8x20xf32, #tpu.memory_space<vmem>>, vector<8x20xf32>
    %c0_3 = arith.constant 0 : index
    %c0_4 = arith.constant 0 : index
    %3 = vector.load %arg3[%c0_3, %c0_4] : memref<160x192xbf16, #tpu.memory_space<vmem>>, vector<160x192xbf16>
    %cst = arith.constant dense<0.000000e+00> : vector<8x192xf32>
    %4 = tpu.matmul %1, %3, %cst {dimension_numbers = #tpu.dot_dimension_numbers<[1], [0], [0], [1], [0, 0, 1, 1], [], []>} : vector<8x160xbf16>, vector<160x192xbf16>, vector<8x192xf32> -> vector<8x192xf32>
    %c0_5 = arith.constant 0 : index
    %c0_6 = arith.constant 0 : index
    %5 = vector.load %arg4[%c0_5, %c0_6] : memref<1x192xf32, #tpu.memory_space<vmem>>, vector<1x192xf32>
    %6 = vector.broadcast %5 : vector<1x192xf32> to vector<8x192xf32>
    %7 = arith.addf %4, %6 : vector<8x192xf32>
    %8 = vector.extract_strided_slice %7 {offsets = [0, 0], sizes = [8, 32], strides = [1, 1]} : vector<8x192xf32> to vector<8x32xf32>
    %cst_7 = arith.constant 0.000000e+00 : f32
    %9 = vector.broadcast %cst_7 : f32 to vector<8x192xf32>
    %10 = arith.maximumf %7, %9 : vector<8x192xf32>
    %11 = arith.truncf %10 : vector<8x192xf32> to vector<8x192xbf16>
    %c0_8 = arith.constant 0 : index
    %c0_9 = arith.constant 0 : index
    %12 = vector.load %arg5[%c0_8, %c0_9] : memref<192x673xbf16, #tpu.memory_space<vmem>>, vector<192x673xbf16>
    %cst_10 = arith.constant dense<0.000000e+00> : vector<8x673xf32>
    %13 = tpu.matmul %11, %12, %cst_10 {dimension_numbers = #tpu.dot_dimension_numbers<[1], [0], [0], [1], [0, 0, 1, 1], [], []>} : vector<8x192xbf16>, vector<192x673xbf16>, vector<8x673xf32> -> vector<8x673xf32>
    %c0_11 = arith.constant 0 : index
    %c0_12 = arith.constant 0 : index
    %14 = vector.load %arg6[%c0_11, %c0_12] : memref<1x673xf32, #tpu.memory_space<vmem>>, vector<1x673xf32>
    %15 = vector.broadcast %14 : vector<1x673xf32> to vector<8x673xf32>
    %16 = arith.addf %13, %15 : vector<8x673xf32>
    %17 = vector.extract_strided_slice %16 {offsets = [0, 0], sizes = [8, 640], strides = [1, 1]} : vector<8x673xf32> to vector<8x640xf32>
    %18 = math.absf %17 : vector<8x640xf32>
    %19 = vector.extract_strided_slice %16 {offsets = [0, 640], sizes = [8, 32], strides = [1, 1]} : vector<8x673xf32> to vector<8x32xf32>
    %20 = math.absf %19 : vector<8x32xf32>
    %21 = vector.extract_strided_slice %16 {offsets = [0, 672], sizes = [8, 1], strides = [1, 1]} : vector<8x673xf32> to vector<8x1xf32>
    %c0_13 = arith.constant 0 : index
    %c0_14 = arith.constant 0 : index
    %22 = vector.load %arg7[%c0_13, %c0_14] : memref<20x640xf32, #tpu.memory_space<vmem>>, vector<20x640xf32>
    %cst_15 = arith.constant dense<0.000000e+00> : vector<8x640xf32>
    %23 = tpu.matmul %2, %22, %cst_15 {dimension_numbers = #tpu.dot_dimension_numbers<[1], [0], [0], [1], [0, 0, 1, 1], [], []>} : vector<8x20xf32>, vector<20x640xf32>, vector<8x640xf32> -> vector<8x640xf32>
    %24 = arith.mulf %23, %18 : vector<8x640xf32>
    %c0_16 = arith.constant 0 : index
    %c0_17 = arith.constant 0 : index
    %25 = vector.load %arg8[%c0_16, %c0_17] : memref<640x32xf32, #tpu.memory_space<vmem>>, vector<640x32xf32>
    %cst_18 = arith.constant dense<0.000000e+00> : vector<8x32xf32>
    %26 = tpu.matmul %24, %25, %cst_18 {dimension_numbers = #tpu.dot_dimension_numbers<[1], [0], [0], [1], [0, 0, 1, 1], [], []>} : vector<8x640xf32>, vector<640x32xf32>, vector<8x32xf32> -> vector<8x32xf32>
    %27 = arith.addf %26, %8 : vector<8x32xf32>
    %cst_19 = arith.constant 0.000000e+00 : f32
    %28 = vector.broadcast %cst_19 : f32 to vector<8x32xf32>
    %29 = arith.minimumf %27, %28 : vector<8x32xf32>
    %30 = math.exp %29 : vector<8x32xf32>
    %cst_20 = arith.constant 1.000000e+00 : f32
    %31 = vector.broadcast %cst_20 : f32 to vector<8x32xf32>
    %32 = arith.subf %30, %31 : vector<8x32xf32>
    %cst_21 = arith.constant 0.000000e+00 : f32
    %33 = vector.broadcast %cst_21 : f32 to vector<8x32xf32>
    %34 = arith.cmpf ogt, %27, %33 : vector<8x32xf32>
    %35 = arith.select %34, %27, %32 : vector<8x32xi1>, vector<8x32xf32>
    %36 = arith.mulf %35, %20 : vector<8x32xf32>
    %cst_22 = arith.constant dense<0.000000e+00> : vector<8xf32>
    %37 = vector.multi_reduction <add>, %36, %cst_22 [1] : vector<8x32xf32> to vector<8xf32>
    %38 = vector.shape_cast %37 : vector<8xf32> to vector<8x1xf32>
    %39 = arith.addf %38, %21 : vector<8x1xf32>
    %c0_23 = arith.constant 0 : index
    %c0_24 = arith.constant 0 : index
    %40 = vector.load %arg9[%c0_23, %c0_24] : memref<8x1xf32, #tpu.memory_space<vmem>>, vector<8x1xf32>
    tpu.vector_store %arg9[%c0_23, %c0_24], %39 {strides = array<i32>} : memref<8x1xf32, #tpu.memory_space<vmem>>, vector<8x1xf32>,
    return
  }
  func.func @transform_0(%arg0: i32) -> (i32, i32) {
    %c0_i32 = arith.constant 0 : i32
    %c0_i32_0 = arith.constant 0 : i32
    return %arg0, %c0_i32 : i32, i32
  }
  func.func @transform_1(%arg0: i32) -> (i32, i32) {
    %c0_i32 = arith.constant 0 : i32
    %c0_i32_0 = arith.constant 0 : i32
    return %arg0, %c0_i32 : i32, i32
  }
  func.func @transform_2(%arg0: i32) -> (i32, i32) {
    %c0_i32 = arith.constant 0 : i32
    %c0_i32_0 = arith.constant 0 : i32
    %c0_i32_1 = arith.constant 0 : i32
    return %c0_i32, %c0_i32_0 : i32, i32
  }
  func.func @transform_3(%arg0: i32) -> (i32, i32) {
    %c0_i32 = arith.constant 0 : i32
    %c0_i32_0 = arith.constant 0 : i32
    %c0_i32_1 = arith.constant 0 : i32
    return %c0_i32, %c0_i32_0 : i32, i32
  }
  func.func @transform_4(%arg0: i32) -> (i32, i32) {
    %c0_i32 = arith.constant 0 : i32
    %c0_i32_0 = arith.constant 0 : i32
    %c0_i32_1 = arith.constant 0 : i32
    return %c0_i32, %c0_i32_0 : i32, i32
  }
  func.func @transform_5(%arg0: i32) -> (i32, i32) {
    %c0_i32 = arith.constant 0 : i32
    %c0_i32_0 = arith.constant 0 : i32
    %c0_i32_1 = arith.constant 0 : i32
    return %c0_i32, %c0_i32_0 : i32, i32
  }
  func.func @transform_6(%arg0: i32) -> (i32, i32) {
    %c0_i32 = arith.constant 0 : i32
    %c0_i32_0 = arith.constant 0 : i32
    %c0_i32_1 = arith.constant 0 : i32
    return %c0_i32, %c0_i32_0 : i32, i32
  }
  func.func @transform_7(%arg0: i32) -> (i32, i32) {
    %c0_i32 = arith.constant 0 : i32
    %c0_i32_0 = arith.constant 0 : i32
    %c0_i32_1 = arith.constant 0 : i32
    return %c0_i32, %c0_i32_0 : i32, i32
  }
  func.func @transform_8(%arg0: i32) -> (i32, i32) {
    %c0_i32 = arith.constant 0 : i32
    %c0_i32_0 = arith.constant 0 : i32
    return %arg0, %c0_i32 : i32, i32
  }
}

</mosaic_0001>

<bundles_post_ra>
// kernel: qmixer_forward.1
= control target key start
LH: loop header
LB: loop body
LE: loop exit
PB: predicated region body
PF: predicated region fallthrough
CT: control target
= control target key end

     0   :  { %vm167_vm0 = vcmask 261120   ;;  %vm680_vm1 = vcmask 523264   ;;  %vm832_vm2 = vcmask 1043456   ;;  %vm828_vm3 = vcmask 162816   ;;  %s2544_s2 = inlined_call_operand.vmem [shape: bf16[160,192], index: 2, kind: input, shape index: {}]   ;;  %s2545_s0 = inlined_call_operand.vmem [shape: f32[8,160], index: 0, kind: input, shape index: {}]   ;;  %s2546_s4 = inlined_call_operand.vmem [shape: bf16[192,673], index: 4, kind: input, shape index: {}]   ;;  %s2547_s3 = inlined_call_operand.vmem [shape: f32[1,192], index: 3, kind: input, shape index: {}]   ;;  %s2548_s6 = inlined_call_operand.vmem [shape: f32[20,640], index: 6, kind: input, shape index: {}]   ;;  %s2549_s1 = inlined_call_operand.vmem [shape: f32[8,20], index: 1, kind: input, shape index: {}]   ;;  %s2550_s7 = inlined_call_operand.vmem [shape: f32[640,32], index: 7, kind: input, shape index: {}]   ;;  %s2551_s5 = inlined_call_operand.vmem [shape: f32[1,673], index: 5, kind: input, shape index: {}]   ;;  %s2552_s8 = inlined_call_operand.vmem [shape: f32[8,1], index: 8, kind: output, shape index: {}]  }
   0x1   :  { %v1719_v0 = vld [vmem:[%s2544_s2 + $0x4] ss:$8 sps:$4 sm:$0xff]   ;;  %v1721_v1 = vld [vmem:[%s2544_s2] ss:$8 sps:$4 sm:$0xff]   ;;  %v1722_v2 = vld [vmem:[%s2544_s2 + $0x14] ss:$8 sps:$4 sm:$0xff]  }
   0x2   :  { %171 = vmatprep.subr.bf16.mxu0 %v1719_v0  ;;  %v1724_v3 = vld [vmem:[%s2544_s2 + $0x10] ss:$8 sps:$4 sm:$0xff]   ;;  %v1725_v4 = vld [vmem:[%s2544_s2 + $0x24] ss:$8 sps:$4 sm:$0xff]   ;;  %v1727_v5 = vld [vmem:[%s2544_s2 + $0x20] ss:$8 sps:$4 sm:$0xff]  }
   0x3   :  { %172 = vmatpush1.bf16.msra.mxu0 %v1721_v1  ;;  %v1728_v6 = vld [vmem:[%s2544_s2 + $0x34] ss:$8 sps:$4 sm:$0xff]   ;;  %v1730_v7 = vld [vmem:[%s2544_s2 + $0x30] ss:$8 sps:$4 sm:$0xff]   ;;  %v1731_v8 = vld [vmem:[%s2544_s2 + $0x44] ss:$8 sps:$4 sm:$0xff]  }
   0x4   :  { %173 = vmatprep.subr.bf16.mxu0 %v1722_v2  ;;  %v1733_v9 = vld [vmem:[%s2544_s2 + $0x40] ss:$8 sps:$4 sm:$0xff]   ;;  %v1749_v12 = vld [vmem:[%s2546_s4 + $0x4] ss:$24 sps:$4 sm:$0xff]   ;;  %v1755_v15 = vld [vmem:[%s2546_s4 + $0x34] ss:$24 sps:$4 sm:$0xff]  }
   0x5   :  { %v31_v10 = vld [vmem:[%s2545_s0 + $0x8] sm:$0xff]  ;;  %v1751_v13 = vld [vmem:[%s2546_s4] ss:$24 sps:$4 sm:$0xff]   ;;  %v1734_v14 = vld [vmem:[%s2544_s2 + $0x54] ss:$8 sps:$4 sm:$0xff]   ;;  %684 = vmatprep.subr.bf16.mxu1 %v1749_v12  ;;  %vm1861_vm4 = vmmov 0  }
   0x6   :  { %v33_v11 = vpack.c.bf16 %v31_v10, %v31_v10  ;;  %685 = vmatpush1.bf16.msra.mxu1 %v1751_v13  ;;  %v1757_v16 = vld [vmem:[%s2546_s4 + $0x30] ss:$24 sps:$4 sm:$0xff]   ;;  %v1737_v18 = vld [vmem:[%s2544_s2 + $0x64] ss:$8 sps:$4 sm:$0xff]   ;;  %v1763_v21 = vld [vmem:[%s2546_s4 + $0x60] ss:$24 sps:$4 sm:$0xff]  }
   0x7   :  { %174 = vmatpush1.bf16.msra.mxu0 %v1724_v3  ;;  %v1736_v17 = vld [vmem:[%s2544_s2 + $0x50] ss:$8 sps:$4 sm:$0xff]   ;;  %686 = vmatprep.subr.bf16.mxu1 %v1755_v15  ;;  %v1761_v19 = vld [vmem:[%s2546_s4 + $0x64] ss:$24 sps:$4 sm:$0xff]   ;;  %v1739_v20 = vld [vmem:[%s2544_s2 + $0x60] ss:$8 sps:$4 sm:$0xff]  }
   0x8   :  { %175 = vmatprep.subr.bf16.mxu0 %v1725_v4  ;;  %1396 = vmatprep.mubr.msk.bf16.mxu0 %vm167_vm0, %v33_v11  ;;  %v1767_v22 = vld [vmem:[%s2546_s4 + $0x94] ss:$24 sps:$4 sm:$0xff]   ;;  %v1742_v24 = vld [vmem:[%s2544_s2 + $0x70] ss:$8 sps:$4 sm:$0xff]   ;;  %v1773_v26 = vld [vmem:[%s2546_s4 + $0xc4] ss:$24 sps:$4 sm:$0xff]  }
   0x9   :  { %v1740_v23 = vld [vmem:[%s2544_s2 + $0x74] ss:$8 sps:$4 sm:$0xff]   ;;  %v1769_v25 = vld [vmem:[%s2546_s4 + $0x90] ss:$24 sps:$4 sm:$0xff]   ;;  %v1743_v27 = vld [vmem:[%s2544_s2 + $0x84] ss:$8 sps:$4 sm:$0xff]  }
   0xa   :  { %687 = vmatpush1.bf16.msra.mxu1 %v1757_v16  ;;  %v1745_v28 = vld [vmem:[%s2544_s2 + $0x80] ss:$8 sps:$4 sm:$0xff]   ;;  %v1779_v30 = vld [vmem:[%s2546_s4 + $0xf4] ss:$24 sps:$4 sm:$0xff]   ;;  %v1748_v32 = vld [vmem:[%s2544_s2 + $0x90] ss:$8 sps:$4 sm:$0xff]  }
   0xb   :  { %176 = vmatpush1.bf16.msra.mxu0 %v1727_v5  ;;  %688 = vmatprep.subr.bf16.mxu1 %v1761_v19  ;;  %v1775_v29 = vld [vmem:[%s2546_s4 + $0xc0] ss:$24 sps:$4 sm:$0xff]   ;;  %v1746_v31 = vld [vmem:[%s2544_s2 + $0x94] ss:$8 sps:$4 sm:$0xff]   ;;  %v1781_v34 = vld [vmem:[%s2546_s4 + $0xf0] ss:$24 sps:$4 sm:$0xff]  }
   0xc   :  { %177 = vmatprep.subr.bf16.mxu0 %v1728_v6  ;;  %v30_v33 = vld [vmem:[%s2545_s0] sm:$0xff]  ;;  %v1791_v40 = vld [vmem:[%s2546_s4 + $0x154] ss:$24 sps:$4 sm:$0xff]   ;;  %v1793_v42 = vld [vmem:[%s2546_s4 + $0x150] ss:$24 sps:$4 sm:$0xff]   ;;  %vm1370_vm6 = vcmask 7168  }
   0xd   :  { %v1785_v35 = vld [vmem:[%s2546_s4 + $0x124] ss:$24 sps:$4 sm:$0xff]   ;;  %v1752_v37 = vld [vmem:[%s2546_s4 + $0x8] ss:$24 sps:$4 sm:$0xff]   ;;  %v32_v38 = vpack.c.bf16 %v30_v33, %v30_v33  ;;  %v1758_v43 = vld [vmem:[%s2546_s4 + $0x38] ss:$24 sps:$4 sm:$0xff]  }
   0xe   :  { %689 = vmatpush1.bf16.msra.mxu1 %v1763_v21  ;;  %v1754_v36 = vld [vmem:[%s2546_s4 + $0xc] ss:$24 sps:$4 sm:$0xff]   ;;  %v1787_v39 = vld [vmem:[%s2546_s4 + $0x120] ss:$24 sps:$4 sm:$0xff]   ;;  %v1760_v41 = vld [vmem:[%s2546_s4 + $0x3c] ss:$24 sps:$4 sm:$0xff]  }
   0xf   :  { %178 = vmatpush1.bf16.msra.mxu0 %v1730_v7  ;;  %690 = vmatprep.subr.bf16.mxu1 %v1767_v22  ;;  %v1797_v44 = vld [vmem:[%s2546_s4 + $0x184] ss:$24 sps:$4 sm:$0xff]   ;;  %v1799_v46 = vld [vmem:[%s2546_s4 + $0x180] ss:$24 sps:$4 sm:$0xff]   ;;  %v1803_v48 = vld [vmem:[%s2546_s4 + $0x1b4] ss:$24 sps:$4 sm:$0xff]  }
  0x10   :  { %179 = vmatprep.subr.bf16.mxu0 %v1731_v8  ;;  %v1766_v45 = vld [vmem:[%s2546_s4 + $0x6c] ss:$24 sps:$4 sm:$0xff]   ;;  %v1764_v47 = vld [vmem:[%s2546_s4 + $0x68] ss:$24 sps:$4 sm:$0xff]   ;;  %v1772_v49 = vld [vmem:[%s2546_s4 + $0x9c] ss:$24 sps:$4 sm:$0xff]  }
  0x11   :  { %v1805_v50 = vld [vmem:[%s2546_s4 + $0x1b0] ss:$24 sps:$4 sm:$0xff]   ;;  %v1778_v52 = vld [vmem:[%s2546_s4 + $0xcc] ss:$24 sps:$4 sm:$0xff]   ;;  %v1784_v54 = vld [vmem:[%s2546_s4 + $0xfc] ss:$24 sps:$4 sm:$0xff]  }
  0x12   :  { %691 = vmatpush1.bf16.msra.mxu1 %v1769_v25  ;;  %v1770_v51 = vld [vmem:[%s2546_s4 + $0x98] ss:$24 sps:$4 sm:$0xff]   ;;  %v1776_v53 = vld [vmem:[%s2546_s4 + $0xc8] ss:$24 sps:$4 sm:$0xff]   ;;  %v1790_v56 = vld [vmem:[%s2546_s4 + $0x12c] ss:$24 sps:$4 sm:$0xff]  }
  0x13   :  { %180 = vmatpush1.bf16.msra.mxu0 %v1733_v9  ;;  %692 = vmatprep.subr.bf16.mxu1 %v1773_v26  ;;  %v1782_v55 = vld [vmem:[%s2546_s4 + $0xf8] ss:$24 sps:$4 sm:$0xff]   ;;  %v1788_v57 = vld [vmem:[%s2546_s4 + $0x128] ss:$24 sps:$4 sm:$0xff]   ;;  %v1796_v58 = vld [vmem:[%s2546_s4 + $0x15c] ss:$24 sps:$4 sm:$0xff]   ;;  %v57_v9 = vlaneseq }
  0x14   :  { %181 = vmatprep.subr.bf16.mxu0 %v1734_v14  ;;  %v1794_v59 = vld [vmem:[%s2546_s4 + $0x158] ss:$24 sps:$4 sm:$0xff]   ;;  %v1802_v60 = vld [vmem:[%s2546_s4 + $0x18c] ss:$24 sps:$4 sm:$0xff]   ;;  %v1800_v61 = vld [vmem:[%s2546_s4 + $0x188] ss:$24 sps:$4 sm:$0xff]  }
  0x15   :  { %v1808_v62 = vld [vmem:[%s2546_s4 + $0x1bc] ss:$24 sps:$4 sm:$0xff]   ;;  %v1806_v63 = vld [vmem:[%s2546_s4 + $0x1b8] ss:$24 sps:$4 sm:$0xff]   ;;  %v1814_v2 = vld [vmem:[%s2546_s4 + $0x1ec] ss:$24 sps:$4 sm:$0xff]  }
  0x16   :  { %693 = vmatpush1.bf16.msra.mxu1 %v1775_v29  ;;  %v1809_v0 = vld [vmem:[%s2546_s4 + $0x1e4] ss:$24 sps:$4 sm:$0xff]   ;;  %v1811_v1 = vld [vmem:[%s2546_s4 + $0x1e0] ss:$24 sps:$4 sm:$0xff]   ;;  %v1815_v4 = vld [vmem:[%s2546_s4 + $0x214] ss:$24 sps:$4 sm:$0xff]  }
  0x17   :  { %182 = vmatpush1.bf16.msra.mxu0 %v1736_v17  ;;  %694 = vmatprep.subr.bf16.mxu1 %v1779_v30  ;;  %v1812_v3 = vld [vmem:[%s2546_s4 + $0x1e8] ss:$24 sps:$4 sm:$0xff]   ;;  %v1820_v6 = vld [vmem:[%s2546_s4 + $0x21c] ss:$24 sps:$4 sm:$0xff]   ;;  %v1818_v7 = vld [vmem:[%s2546_s4 + $0x218] ss:$24 sps:$4 sm:$0xff]  }
  0x18   :  { %183 = vmatprep.subr.bf16.mxu0 %v1737_v18  ;;  %v1817_v5 = vld [vmem:[%s2546_s4 + $0x210] ss:$24 sps:$4 sm:$0xff]   ;;  %v1823_v8 = vld [vmem:[%s2546_s4 + $0x14] ss:$24 sps:$4 sm:$0xff]   ;;  %v2122_v10 = vshrl.u32 %v57_v9, 7 }
  0x19   :  { %v55_v12 = vld [vmem:[%s2547_s3] sm:$0x3]  ;;  %v1821_v25 = vld [vmem:[%s2546_s4 + $0x10] ss:$24 sps:$4 sm:$0xff]   ;;  %v1829_v29 = vld [vmem:[%s2546_s4 + $0x74] ss:$24 sps:$4 sm:$0xff]  }
  0x1a   :  { %695 = vmatpush1.bf16.msra.mxu1 %v1781_v34  ;;  %v59_v11 = vsub.s32 0, %v2122_v10  ;;  %v63_v13 = vsub.s32 1, %v2122_v10  ;;  %v1827_v30 = vld [vmem:[%s2546_s4 + $0x70] ss:$24 sps:$4 sm:$0xff]   ;;  %v1835_v33 = vld [vmem:[%s2546_s4 + $0xd4] ss:$24 sps:$4 sm:$0xff]  }
  0x1b   :  { %184 = vmatpush1.bf16.msra.mxu0 %v1739_v20  ;;  %696 = vmatprep.subr.bf16.mxu1 %v1785_v35  ;;  %v1833_v34 = vld [vmem:[%s2546_s4 + $0xd0] ss:$24 sps:$4 sm:$0xff]   ;;  %v1838_v35 = vld [vmem:[%s2546_s4 + $0x104] ss:$24 sps:$4 sm:$0xff]  }
  0x1c   :  { %185 = vmatprep.subr.bf16.mxu0 %v1740_v23  ;;  %v60_v14 = vrot.slane %v55_v12, %v59_v11  ;;  %v64_v15 = vrot.slane %v55_v12, %v63_v13  ;;  %v1082_v9 = vld [vmem:[%s2550_s7 + $0x88] sm:$0xff]  ;;  %v1065_v12 = vld [vmem:[%s2550_s7] sm:$0xff] }
  0x1e   :  { %697 = vmatpush1.bf16.msra.mxu1 %v1787_v39  ;;  %v1844_v39 = vld [vmem:[%s2546_s4 + $0x164] ss:$24 sps:$4 sm:$0xff]  }
  0x1f   :  { %186 = vmatpush1.bf16.msra.mxu0 %v1742_v24  ;;  %698 = vmatprep.subr.bf16.mxu1 %v1791_v40  ;;  %v1842_v40 = vld [vmem:[%s2546_s4 + $0x160] ss:$24 sps:$4 sm:$0xff]  }
  0x20   :  { %187 = vmatprep.subr.bf16.mxu0 %v1743_v27  ;;  %v1826_v27 = vld [vmem:[%s2546_s4 + $0x44] ss:$24 sps:$4 sm:$0xff]  }
  0x22   :  { %699 = vmatpush1.bf16.msra.mxu1 %v1793_v42  ;;  %v1845_v42 = vld [vmem:[%s2546_s4 + $0x190] ss:$24 sps:$4 sm:$0xff]  }
  0x23   :  { %188 = vmatpush1.bf16.msra.mxu0 %v1745_v28  ;;  %700 = vmatprep.subr.bf16.mxu1 %v1797_v44  ;;  %v1824_v28 = vld [vmem:[%s2546_s4 + $0x40] ss:$24 sps:$4 sm:$0xff]  }
  0x24   :  { %189 = vmatprep.subr.bf16.mxu0 %v1746_v31  ;;  %v1832_v31 = vld [vmem:[%s2546_s4 + $0xa4] ss:$24 sps:$4 sm:$0xff]   ;;  %v1848_v44 = vld [vmem:[%s2546_s4 + $0x1c0] ss:$24 sps:$4 sm:$0xff]  }
  0x26   :  { %701 = vmatpush1.bf16.msra.mxu1 %v1799_v46  ;;  %v1851_v46 = vld [vmem:[%s2546_s4 + $0x1f0] ss:$24 sps:$4 sm:$0xff]  }
  0x27   :  { %190 = vmatpush1.bf16.msra.mxu0 %v1748_v32  ;;  %702 = vmatprep.subr.bf16.mxu1 %v1803_v48  ;;  %v1830_v32 = vld [vmem:[%s2546_s4 + $0xa0] ss:$24 sps:$4 sm:$0xff]   ;;  %v814_v48 = vld [vmem:[%s2548_s6 + $0x8] sm:$0xff] }
  0x28   :  { %725 = vmatprep.subr.bf16.mxu0 %v1754_v36  ;;  %v1836_v36 = vld [vmem:[%s2546_s4 + $0x100] ss:$24 sps:$4 sm:$0xff]  }
  0x2a   :  { %204 = vmatmul.mubr.bf16.vlgmr.msra.gmra.mrb[0].mxu0 %v32_v38  ;;  %703 = vmatpush1.bf16.msra.mxu1 %v1805_v50  ;;  %v1839_v38 = vld [vmem:[%s2546_s4 + $0x130] ss:$24 sps:$4 sm:$0xff]   ;;  %v1854_v50 = vld [vmem:[%s2546_s4 + $0x220] ss:$24 sps:$4 sm:$0xff]  }
  0x2b   :  { %726 = vmatpush1.bf16.msra.mxu0 %v1752_v37  ;;  %704 = vmatprep.subr.bf16.mxu1 %v1809_v0  ;;  %v1841_v37 = vld [vmem:[%s2546_s4 + $0x134] ss:$24 sps:$4 sm:$0xff]  }
  0x2c   :  { %727 = vmatprep.subr.bf16.mxu0 %v1760_v41  ;;  %v1847_v41 = vld [vmem:[%s2546_s4 + $0x194] ss:$24 sps:$4 sm:$0xff]  }
  0x2e   :  { %705 = vmatpush1.bf16.msra.mxu1 %v1811_v1  ;;  %v826_v1 = vld [vmem:[%s2548_s6 + $0x68] sm:$0xf] }
  0x2f   :  { %728 = vmatpush1.bf16.msra.mxu0 %v1758_v43  ;;  %706 = vmatprep.subr.bf16.mxu1 %v1815_v4  ;;  %v1850_v43 = vld [vmem:[%s2546_s4 + $0x1c4] ss:$24 sps:$4 sm:$0xff]   ;;  %v825_v4 = vld [vmem:[%s2548_s6 + $0x60] sm:$0xf] }
  0x30   :  { %729 = vmatprep.subr.bf16.mxu0 %v1766_v45  ;;  %v1853_v45 = vld [vmem:[%s2546_s4 + $0x1f4] ss:$24 sps:$4 sm:$0xff]  }
  0x32   :  { %707 = vmatpush1.bf16.msra.mxu1 %v1817_v5 }
  0x33   :  { %730 = vmatpush1.bf16.msra.mxu0 %v1764_v47  ;;  %766 = vmatprep.subr.bf16.mxu1 %v1823_v8  ;;  %v1856_v47 = vld [vmem:[%s2546_s4 + $0x224] ss:$24 sps:$4 sm:$0xff]  }
  0x34   :  { %731 = vmatprep.subr.bf16.mxu0 %v1772_v49  ;;  %v819_v49 = vld [vmem:[%s2548_s6 + $0x30] sm:$0xff]  ;;  %v1081_v8 = vld [vmem:[%s2550_s7 + $0x80] sm:$0xff] }
  0x37   :  { %732 = vmatpush1.bf16.msra.mxu0 %v1770_v51  ;;  %v1616_v51 = vpack.c.bf16 %v819_v49, %v814_v48  ;;  %v1071_v48 = vld [vmem:[%s2550_s7 + $0x30] sm:$0xff]  ;;  %v1072_v49 = vld [vmem:[%s2550_s7 + $0x38] sm:$0xff] }
  0x38   :  { %733 = vmatprep.subr.bf16.mxu0 %v1778_v52  ;;  %v813_v52 = vld [vmem:[%s2548_s6] sm:$0xff] }
  0x3b   :  { %734 = vmatpush1.bf16.msra.mxu0 %v1776_v53  ;;  %v818_v53 = vld [vmem:[%s2548_s6 + $0x28] sm:$0xff] }
  0x3c   :  { %735 = vmatprep.subr.bf16.mxu0 %v1784_v54  ;;  %v1618_v54 = vpack.c.bf16 %v818_v53, %v813_v52  ;;  %v1089_v52 = vld [vmem:[%s2550_s7 + $0xc0] sm:$0xff]  ;;  %v1090_v53 = vld [vmem:[%s2550_s7 + $0xc8] sm:$0xff] }
  0x3f   :  { %736 = vmatpush1.bf16.msra.mxu0 %v1782_v55  ;;  %v824_v55 = vld [vmem:[%s2548_s6 + $0x58] sm:$0xf] }
  0x40   :  { %737 = vmatprep.subr.bf16.mxu0 %v1790_v56  ;;  %v816_v56 = vld [vmem:[%s2548_s6 + $0x18] sm:$0xff] }
  0x43   :  { %738 = vmatpush1.bf16.msra.mxu0 %v1788_v57  ;;  %v821_v57 = vld [vmem:[%s2548_s6 + $0x40] sm:$0xff] }
  0x44   :  { %739 = vmatprep.subr.bf16.mxu0 %v1796_v58  ;;  %v1859_v58 = vmov 0.0  }
  0x47   :  { %740 = vmatpush1.bf16.msra.mxu0 %v1794_v59  ;;  %v823_v59 = vld [vmem:[%s2548_s6 + $0x50] sm:$0xf] }
  0x48   :  { %741 = vmatprep.subr.bf16.mxu0 %v1802_v60  ;;  %v1620_v60 = vpack.c.bf16 %v821_v57, %v816_v56  ;;  %v1120_v56 = vld [vmem:[%s2550_s7 + $0x1b8] sm:$0xff]  ;;  %v1641_v57 = vpack.c.bf16 %v1072_v49, %v1071_v48 }
  0x49   :  { %v1112_v48 = vld [vmem:[%s2550_s7 + $0x178] sm:$0xff] }
  0x4b   :  { %742 = vmatpush1.bf16.msra.mxu0 %v1800_v61  ;;  %v815_v61 = vld [vmem:[%s2548_s6 + $0x10] sm:$0xff] }
  0x4c   :  { %743 = vmatprep.subr.bf16.mxu0 %v1808_v62  ;;  %v820_v62 = vld [vmem:[%s2548_s6 + $0x38] sm:$0xff] }
  0x4d   :  { %v1622_v0 = vpack.c.bf16 %v820_v62, %v815_v61  ;;  %v1104_v61 = vld [vmem:[%s2550_s7 + $0x138] sm:$0xff]  ;;  %v1643_v62 = vpack.c.bf16 %v1090_v53, %v1089_v52 }
  0x4f   :  { %744 = vmatpush1.bf16.msra.mxu0 %v1806_v63  ;;  %v34_v63 = vld [vmem:[%s2549_s1] sm:$0xff] }
  0x50   :  { %745 = vmatprep.subr.bf16.mxu0 %v1814_v2  ;;  %v817_v2 = vld [vmem:[%s2548_s6 + $0x20] sm:$0xff] }
  0x53   :  { %746 = vmatpush1.bf16.msra.mxu0 %v1812_v3  ;;  %v822_v3 = vld [vmem:[%s2548_s6 + $0x48] sm:$0xff] }
  0x54   :  { %747 = vmatprep.subr.bf16.mxu0 %v1820_v6  ;;  %v1625_v5 = vpack.c.bf16 %v822_v3, %v817_v2  ;;  %v1860_v6 = vmov 0.0|0.0   ;;  %v1091_v3 = vld [vmem:[%s2550_s7 + $0xd0] sm:$0xff] }
  0x57   :  { %748 = vmatpush1.bf16.msra.mxu0 %v1818_v7  ;;  %v827_v7 = vld [vmem:[%s2548_s6 + $0x70] sm:$0xf] }
  0xfd   :  { %v205_v16 = vpop.f32.mrb[0].mxu0 }
  0xfe   :  { %v2133_v17 = vadd.f32 %v205_v16, %v60_v14  ;;  %v207_v18 = vpop.f32.mrb[1].mxu0  ;;  %v1627_v14 = vpack.c.bf16 %v1082_v9, %v1081_v8  ;;  %v1083_v16 = vld [vmem:[%s2550_s7 + $0x90] sm:$0xff]  ;;  %v1076_v8 = vld [vmem:[%s2550_s7 + $0x58] sm:$0xff] }
  0xff   :  { %v208_v19 = vadd.f32 %v207_v18, %v64_v15  ;;  %v209_v20 = vpop.f32.mrb[2].mxu0  ;;  %v1066_v15 = vld [vmem:[%s2550_s7 + $0x8] sm:$0xff]  ;;  %v1084_v18 = vld [vmem:[%s2550_s7 + $0x98] sm:$0xff] }
 0x100   :  { %v212_v21 = vmax.f32 %v2133_v17, 0.0  ;;  %v210_v22 = vpop.f32.mrb[3].mxu0  ;;  %v1631_v20 = vpack.c.bf16 %v1084_v18, %v1083_v16  ;;  %1628 = vmatprep.subr.bf16.mxu0 %v1627_v14  ;;  %v1122_v14 = vld [vmem:[%s2550_s7 + $0x1c8] sm:$0xff]  ;;  %v1105_v16 = vld [vmem:[%s2550_s7 + $0x140] sm:$0xff] }
 0x101   :  { %v213_v23 = vmax.f32 %v208_v19, 0.0  ;;  %v1629_v19 = vpack.c.bf16 %v1066_v15, %v1065_v12  ;;  %v1068_v22 = vld [vmem:[%s2550_s7 + $0x18] sm:$0xff]  ;;  %v1121_v12 = vld [vmem:[%s2550_s7 + $0x1c0] sm:$0xff]  ;;  %v1106_v18 = vld [vmem:[%s2550_s7 + $0x148] sm:$0xff] }
 0x102   :  { %v214_v26 = vpack.c.bf16 %v212_v21, %v212_v21  ;;  %v1067_v21 = vld [vmem:[%s2550_s7 + $0x10] sm:$0xff]  ;;  %v1675_v15 = vpack.c.bf16 %v1122_v14, %v1121_v12  ;;  %v1130_v12 = vld [vmem:[%s2550_s7 + $0x208] sm:$0xff] }
 0x103   :  { %v215_v24 = vpack.c.bf16 %v213_v23, %v213_v23  ;;  %v1113_v23 = vld [vmem:[%s2550_s7 + $0x180] sm:$0xff] }
 0x105   :  { %1469 = vmatprep.mubr.msk.bf16.mxu1 %vm680_vm1, %v215_v24  ;;  %1470 = vmatprep.mubr.msk.bf16.mxu0 %vm680_vm1, %v215_v24 }
 0x106   :  { %717 = vmatmul.mubr.bf16.vlgmr.msra.gmra.mrb[0].mxu1 %v214_v26  ;;  %758 = vmatmul.mubr.bf16.vlgmr.msra.gmra.mrb[4].mxu0 %v214_v26 }
 0x107   :  { %767 = vmatpush1.bf16.msra.mxu1 %v1821_v25  ;;  %1471 = vmatprep.mubr.msk.bf16.mxu1 %vm680_vm1, %v215_v24  ;;  %v1114_v24 = vld [vmem:[%s2550_s7 + $0x188] sm:$0xff]  ;;  %v1097_v25 = vld [vmem:[%s2550_s7 + $0x100] sm:$0xff] }
 0x108   :  { %768 = vmatprep.subr.bf16.mxu1 %v1826_v27  ;;  %1630 = vmatpush3.bf16.msra.mxu0 %v1629_v19  ;;  %v1633_v27 = vpack.c.bf16 %v1068_v22, %v1067_v21  ;;  %v1677_v19 = vpack.c.bf16 %v1106_v18, %v1105_v16  ;;  %v1094_v21 = vld [vmem:[%s2550_s7 + $0xe8] sm:$0xff] }
 0x109   :  { %1632 = vmatprep.subr.bf16.mxu0 %v1631_v20  ;;  %v1093_v20 = vld [vmem:[%s2550_s7 + $0xe0] sm:$0xff] }
 0x10a   :  { %v1651_v22 = vpack.c.bf16 %v1094_v21, %v1093_v20 }
 0x10b   :  { %769 = vmatpush1.bf16.msra.mxu1 %v1824_v28  ;;  %v1659_v28 = vpack.c.bf16 %v1114_v24, %v1113_v23  ;;  %v1077_v23 = vld [vmem:[%s2550_s7 + $0x60] sm:$0xff]  ;;  %v1078_v24 = vld [vmem:[%s2550_s7 + $0x68] sm:$0xff] }
 0x10c   :  { %770 = vmatprep.subr.bf16.mxu1 %v1829_v29  ;;  %1634 = vmatpush3.bf16.msra.mxu0 %v1633_v27  ;;  %v1124_v27 = vld [vmem:[%s2550_s7 + $0x1d8] sm:$0xff] }
 0x10f   :  { %771 = vmatpush1.bf16.msra.mxu1 %v1827_v30  ;;  %v1085_v30 = vld [vmem:[%s2550_s7 + $0xa0] sm:$0xff] }
 0x110   :  { %772 = vmatprep.subr.bf16.mxu1 %v1832_v31  ;;  %v1086_v31 = vld [vmem:[%s2550_s7 + $0xa8] sm:$0xff] }
 0x113   :  { %773 = vmatpush1.bf16.msra.mxu1 %v1830_v32  ;;  %v1069_v32 = vld [vmem:[%s2550_s7 + $0x20] sm:$0xff] }
 0x114   :  { %774 = vmatprep.subr.bf16.mxu1 %v1835_v33  ;;  %v1635_v33 = vpack.c.bf16 %v1086_v31, %v1085_v30  ;;  %v1108_v30 = vld [vmem:[%s2550_s7 + $0x158] sm:$0xff] }
 0x116   :  { %1636 = vmatprep.subr.bf16.mxu0 %v1635_v33  ;;  %v1096_v33 = vld [vmem:[%s2550_s7 + $0xf8] sm:$0xff] }
 0x117   :  { %775 = vmatpush1.bf16.msra.mxu1 %v1833_v34  ;;  %v1070_v34 = vld [vmem:[%s2550_s7 + $0x28] sm:$0xff] }
 0x118   :  { %776 = vmatprep.subr.bf16.mxu1 %v1838_v35  ;;  %v1115_v35 = vld [vmem:[%s2550_s7 + $0x190] sm:$0xff] }
 0x11b   :  { %777 = vmatpush1.bf16.msra.mxu1 %v1836_v36  ;;  %v1116_v36 = vld [vmem:[%s2550_s7 + $0x198] sm:$0xff] }
 0x11c   :  { %778 = vmatprep.subr.bf16.mxu1 %v1841_v37  ;;  %v1663_v37 = vpack.c.bf16 %v1116_v36, %v1115_v35  ;;  %v1079_v35 = vld [vmem:[%s2550_s7 + $0x70] sm:$0xff]  ;;  %v1080_v36 = vld [vmem:[%s2550_s7 + $0x78] sm:$0xff] }
 0x11f   :  { %779 = vmatpush1.bf16.msra.mxu1 %v1839_v38  ;;  %v1099_v38 = vld [vmem:[%s2550_s7 + $0x110] sm:$0xff] }
 0x120   :  { %780 = vmatprep.subr.bf16.mxu1 %v1844_v39  ;;  %v1100_v39 = vld [vmem:[%s2550_s7 + $0x118] sm:$0xff] }
 0x123   :  { %781 = vmatpush1.bf16.msra.mxu1 %v1842_v40  ;;  %v1087_v40 = vld [vmem:[%s2550_s7 + $0xb0] sm:$0xff] }
 0x124   :  { %782 = vmatprep.subr.bf16.mxu1 %v1847_v41  ;;  %v1665_v41 = vpack.c.bf16 %v1100_v39, %v1099_v38  ;;  %v1125_v38 = vld [vmem:[%s2550_s7 + $0x1e0] sm:$0xff]  ;;  %v1126_v39 = vld [vmem:[%s2550_s7 + $0x1e8] sm:$0xff] }
 0x127   :  { %783 = vmatpush1.bf16.msra.mxu1 %v1845_v42  ;;  %v1088_v42 = vld [vmem:[%s2550_s7 + $0xb8] sm:$0xff] }
 0x128   :  { %784 = vmatprep.subr.bf16.mxu1 %v1850_v43  ;;  %v1637_v43 = vpack.c.bf16 %v1070_v34, %v1069_v32  ;;  %v1095_v32 = vld [vmem:[%s2550_s7 + $0xf0] sm:$0xff] }
 0x129   :  { %v1655_v34 = vpack.c.bf16 %v1096_v33, %v1095_v32  ;;  %v1133_v33 = vld [vmem:[%s2550_s7 + $0x220] sm:$0xff] }
 0x12a   :  { %1638 = vmatpush3.bf16.msra.mxu0 %v1637_v43 }
 0x12b   :  { %785 = vmatpush1.bf16.msra.mxu1 %v1848_v44  ;;  %v1117_v44 = vld [vmem:[%s2550_s7 + $0x1a0] sm:$0xff] }
 0x12c   :  { %786 = vmatprep.subr.bf16.mxu1 %v1853_v45  ;;  %v1118_v45 = vld [vmem:[%s2550_s7 + $0x1a8] sm:$0xff] }
 0x12f   :  { %787 = vmatpush1.bf16.msra.mxu1 %v1851_v46  ;;  %v1101_v46 = vld [vmem:[%s2550_s7 + $0x120] sm:$0xff] }
 0x130   :  { %788 = vmatprep.subr.bf16.mxu1 %v1856_v47  ;;  %v1639_v47 = vpack.c.bf16 %v1088_v42, %v1087_v40  ;;  %v1683_v40 = vpack.c.bf16 %v1126_v39, %v1125_v38  ;;  %v1110_v42 = vld [vmem:[%s2550_s7 + $0x168] sm:$0xff]  ;;  %v1136_v38 = vld [vmem:[%s2550_s7 + $0x238] sm:$0xff] }
 0x132   :  { %1640 = vmatprep.subr.bf16.mxu0 %v1639_v47  ;;  %v1111_v47 = vld [vmem:[%s2550_s7 + $0x170] sm:$0xff] }
 0x133   :  { %789 = vmatpush1.bf16.msra.mxu1 %v1854_v50  ;;  %v1667_v50 = vpack.c.bf16 %v1118_v45, %v1117_v44  ;;  %1642 = vmatpush3.bf16.msra.mxu0 %v1641_v57  ;;  %v1127_v44 = vld [vmem:[%s2550_s7 + $0x1f0] sm:$0xff]  ;;  %v1128_v45 = vld [vmem:[%s2550_s7 + $0x1f8] sm:$0xff]  ;;  %v1689_v49 = vpack.c.bf16 %v1112_v48, %v1111_v47 }
 0x134   :  { %1617 = vmatprep.subr.bf16.mxu1 %v1616_v51  ;;  %v1102_v51 = vld [vmem:[%s2550_s7 + $0x128] sm:$0xff]  ;;  %1644 = vmatprep.subr.bf16.mxu0 %v1643_v62  ;;  %v1140_v47 = vld [vmem:[%s2550_s7 + $0x258] sm:$0xff] }
 0x136   :  { %799 = vmatmul.mubr.bf16.vlgmr.msra.gmra.mrb[4].mxu1 %v214_v26  ;;  %v1098_v26 = vld [vmem:[%s2550_s7 + $0x108] sm:$0xff] }
 0x137   :  { %1619 = vmatpush1.bf16.msra.mxu1 %v1618_v54  ;;  %912 = vmatprep.mubr.f32.mxu1 %v1859_v58  ;;  %v1661_v29 = vpack.c.bf16 %v1098_v26, %v1097_v25  ;;  %v1119_v54 = vld [vmem:[%s2550_s7 + $0x1b0] sm:$0xff]  ;;  %v1653_v25 = vpack.c.bf16 %v1078_v24, %v1077_v23 }
 0x138   :  { %1472 = vmatprep.subr.msk.mxu1 %vm832_vm2, %v824_v55  ;;  %v1669_v55 = vpack.c.bf16 %v1102_v51, %v1101_v46  ;;  %v1123_v26 = vld [vmem:[%s2550_s7 + $0x1d0] sm:$0xff]  ;;  %v1687_v46 = vpack.c.bf16 %v1128_v45, %v1127_v44  ;;  %v1138_v44 = vld [vmem:[%s2550_s7 + $0x248] sm:$0xff] }
 0x139   :  { %v1131_v24 = vld [vmem:[%s2550_s7 + $0x210] sm:$0xff] }
 0x13b   :  { %1473 = vmatpush1.msk.msra.mxu1 %vm832_vm2, %v823_v59  ;;  %v1671_v59 = vpack.c.bf16 %v1120_v56, %v1119_v54 }
 0x13c   :  { %1621 = vmatprep.subr.bf16.mxu1 %v1620_v60  ;;  %v1103_v60 = vld [vmem:[%s2550_s7 + $0x130] sm:$0xff] }
 0x13e   :  { %1474 = vmatmul.mubr.msk.f32.vlgmr.msra.gmra.mrb[8].mxu1 %vm828_vm3, %v34_v63 }
 0x13f   :  { %1623 = vmatpush1.bf16.msra.mxu1 %v1622_v0  ;;  %983 = vmatprep.mubr.f32.mxu1 %v1859_v58  ;;  %v1074_v0 = vld [vmem:[%s2550_s7 + $0x48] sm:$0xff] }
 0x140   :  { %1475 = vmatprep.subr.msk.mxu1 %vm832_vm2, %v826_v1  ;;  %v1673_v1 = vpack.c.bf16 %v1104_v61, %v1103_v60 }
 0x143   :  { %1476 = vmatpush1.msk.msra.mxu1 %vm832_vm2, %v825_v4  ;;  %v1092_v4 = vld [vmem:[%s2550_s7 + $0xd8] sm:$0xff] }
 0x144   :  { %1477 = vmatmul.mubr.msk.f32.vlgmr.msra.gmra.mrb[10].mxu1 %vm828_vm3, %v34_v63  ;;  %1624 = vmatprep.subr.bf16.mxu1 %v1860_v6 }
 0x145   :  { %1626 = vmatpush3.bf16.msra.mxu1 %v1625_v5  ;;  %1578 = vmatprep.mubr.msk.f32.mxu1 %vm1861_vm4, %v1859_v58  ;;  %v1647_v5 = vpack.c.bf16 %v1092_v4, %v1091_v3 }
 0x146   :  { %1576 = vmatprep.subr.mxu1 %v1859_v58 }
 0x149   :  { %1577 = vmatpush3.msk.msra.mxu1 %vm832_vm2, %v827_v7  ;;  %v1075_v7 = vld [vmem:[%s2550_s7 + $0x50] sm:$0xff] }
 0x14a   :  { %1579 = vmatmul.mubr.msk.f32.vlgmr.msra.gmra.mrb[12].mxu1 %vm828_vm3, %v34_v63  ;;  %1660 = vmatprep.subr.bf16.mxu1 %v1659_v28  ;;  %v1073_v63 = vld [vmem:[%s2550_s7 + $0x40] sm:$0xff]  ;;  %v1649_v9 = vpack.c.bf16 %v1076_v8, %v1075_v7  ;;  %v1107_v28 = vld [vmem:[%s2550_s7 + $0x150] sm:$0xff] }
 0x14b   :  { %1662 = vmatpush3.bf16.msra.mxu1 %v1661_v29  ;;  %v1645_v2 = vpack.c.bf16 %v1074_v0, %v1073_v63  ;;  %v1679_v29 = vpack.c.bf16 %v1124_v27, %v1123_v26  ;;  %v1681_v31 = vpack.c.bf16 %v1108_v30, %v1107_v28  ;;  %v300_v63 = vsub.s32 2, %v2122_v10 }
 0x14c   :  { %1664 = vmatprep.subr.bf16.mxu1 %v1663_v37  ;;  %v1657_v37 = vpack.c.bf16 %v1080_v36, %v1079_v35 }
 0x14d   :  { %1646 = vmatpush3.bf16.msra.mxu0 %v1645_v2 }
 0x14e   :  { %1648 = vmatprep.subr.bf16.mxu0 %v1647_v5 }
 0x14f   :  { %1666 = vmatpush3.bf16.msra.mxu1 %v1665_v41  ;;  %v1109_v41 = vld [vmem:[%s2550_s7 + $0x160] sm:$0xff] }
 0x150   :  { %1668 = vmatprep.subr.bf16.mxu1 %v1667_v50  ;;  %v1685_v43 = vpack.c.bf16 %v1110_v42, %v1109_v41 }
 0x151   :  { %1650 = vmatpush3.bf16.msra.mxu0 %v1649_v9  ;;  %v308_v9 = vsub.s32 4, %v2122_v10 }
 0x152   :  { %1652 = vmatprep.subr.bf16.mxu0 %v1651_v22 }
 0x153   :  { %1670 = vmatpush3.bf16.msra.mxu1 %v1669_v55 }
 0x154   :  { %1672 = vmatprep.subr.bf16.mxu1 %v1671_v59  ;;  %v2463_v59 = vld [vmem:[%s2551_s5] sm:$0x3f] }
 0x155   :  { %1654 = vmatpush3.bf16.msra.mxu0 %v1653_v25  ;;  %v293_v60 = vrot.slane %v2463_v59, %v59_v11  ;;  %v297_v61 = vrot.slane %v2463_v59, %v63_v13  ;;  %v301_v7 = vrot.slane %v2463_v59, %v300_v63  ;;  %v1129_v13 = vld [vmem:[%s2550_s7 + $0x200] sm:$0xff]  ;;  %v309_v23 = vrot.slane %v2463_v59, %v308_v9  ;;  %v1132_v25 = vld [vmem:[%s2550_s7 + $0x218] sm:$0xff] }
 0x156   :  { %1656 = vmatprep.subr.bf16.mxu0 %v1655_v34  ;;  %v1692_v22 = vpack.c.bf16 %v1130_v12, %v1129_v13  ;;  %v1134_v34 = vld [vmem:[%s2550_s7 + $0x228] sm:$0xff] }
 0x157   :  { %1674 = vmatpush3.bf16.msra.mxu1 %v1673_v1  ;;  %v304_v1 = vsub.s32 3, %v2122_v10  ;;  %v1698_v36 = vpack.c.bf16 %v1134_v34, %v1133_v33 }
 0x158   :  { %1676 = vmatprep.subr.bf16.mxu1 %v1675_v15 }
 0x159   :  { %1658 = vmatpush3.bf16.msra.mxu0 %v1657_v37  ;;  %v305_v8 = vrot.slane %v2463_v59, %v304_v1 }
 0x15a   :  { %1691 = vmatprep.subr.bf16.mxu0 %v1860_v6 }
 0x15b   :  { %1678 = vmatpush3.bf16.msra.mxu1 %v1677_v19 }
 0x15c   :  { %1680 = vmatprep.subr.bf16.mxu1 %v1679_v29  ;;  %v1695_v29 = vpack.c.bf16 %v1132_v25, %v1131_v24 }
 0x15f   :  { %1682 = vmatpush3.bf16.msra.mxu1 %v1681_v31 }
 0x160   :  { %1684 = vmatprep.subr.bf16.mxu1 %v1683_v40 }
 0x163   :  { %1686 = vmatpush3.bf16.msra.mxu1 %v1685_v43  ;;  %v1137_v43 = vld [vmem:[%s2550_s7 + $0x240] sm:$0xff] }
 0x164   :  { %1688 = vmatprep.subr.bf16.mxu1 %v1687_v46  ;;  %v1704_v45 = vpack.c.bf16 %v1138_v44, %v1137_v43  ;;  %v1139_v46 = vld [vmem:[%s2550_s7 + $0x250] sm:$0xff] }
 0x165   :  { %v1707_v48 = vpack.c.bf16 %v1140_v47, %v1139_v46 }
 0x167   :  { %1690 = vmatpush3.bf16.msra.mxu1 %v1689_v49  ;;  %v1141_v49 = vld [vmem:[%s2550_s7 + $0x260] sm:$0xff] }
 0x1d9   :  { %v718_v50 = vpop.f32.mrb[0].mxu1  ;;  %v759_v51 = vpop.f32.mrb[4].mxu0 }
 0x1da   :  { %v720_v52 = vpop.f32.mrb[1].mxu1  ;;  %v761_v53 = vpop.f32.mrb[5].mxu0  ;;  %v719_v3 = vadd.f32 %v718_v50, %v293_v60  ;;  %v760_v16 = vadd.f32 %v759_v51, %v301_v7  ;;  %v1142_v50 = vld [vmem:[%s2550_s7 + $0x268] sm:$0xff] }
 0x1db   :  { %v722_v54 = vpop.f32.mrb[2].mxu1  ;;  %v763_v55 = vpop.f32.mrb[6].mxu0  ;;  %v721_v5 = vadd.f32 %v720_v52, %v297_v61  ;;  %v762_v20 = vadd.f32 %v761_v53, %v305_v8  ;;  %v1710_v51 = vpack.c.bf16 %v1142_v50, %v1141_v49  ;;  %v1143_v52 = vld [vmem:[%s2550_s7 + $0x270] sm:$0xff]  ;;  %v1144_v53 = vld [vmem:[%s2550_s7 + $0x278] sm:$0xff]  ;;  %v312_v8 = vsub.s32 5, %v2122_v10 }
 0x1dc   :  { %v723_v56 = vpop.f32.mrb[3].mxu1  ;;  %v764_v57 = vpop.f32.mrb[7].mxu0  ;;  %v807_v11 = vand.u32 2147483647, %v719_v3  ;;  %v809_v26 = vand.u32 2147483647, %v760_v16  ;;  %v1713_v54 = vpack.c.bf16 %v1144_v53, %v1143_v52 }
 0x1dd   :  { %v808_v14 = vand.u32 2147483647, %v721_v5  ;;  %v810_v27 = vand.u32 2147483647, %v762_v20 }
 0x209   :  { %v800_v62 = vpop.f32.mrb[4].mxu1 }
 0x20a   :  { %v2472_v0 = vpop.f32.mrb[5].mxu1  ;;  %v801_v30 = vadd.f32 %v800_v62, %v309_v23 }
 0x20b   :  { %v804_v2 = vpop.f32.mrb[6].mxu1 }
 0x20c   :  { %v805_v4 = vpop.f32.mrb[7].mxu1  ;;  %v811_v37 = vand.u32 2147483647, %v801_v30 }
 0x211   :  { %v914_v15 = vpop.f32.mrb[8].mxu1 }
 0x212   :  { %v1060_v18 = vmul.f32 %v914_v15, %v807_v11  ;;  %v916_v19 = vpop.f32.mrb[9].mxu1 }
 0x213   :  { %v1061_v21 = vmul.f32 %v916_v19, %v808_v14 }
 0x215   :  { %1209 = vmatprep.mubr.f32.mxu0 %v1061_v21 }
 0x216   :  { %1210 = vmatmul.mubr.f32.vlgmr.msra.gmra.mrb[8].mxu0 %v1060_v18 }
 0x217   :  { %v985_v28 = vpop.f32.mrb[10].mxu1  ;;  %1693 = vmatpush3.bf16.msra.mxu0 %v1692_v22  ;;  %1613 = vmatprep.mubr.msk.f32.mxu0 %vm1861_vm4, %v1859_v58  ;;  %v1135_v58 = vld [vmem:[%s2550_s7 + $0x230] sm:$0xff]  ;;  %s1862_s7 = smov 96  }
 0x218   :  { %v1062_v31 = vmul.f32 %v985_v28, %v809_v26  ;;  %v987_v32 = vpop.f32.mrb[11].mxu1  ;;  %1694 = vmatprep.subr.bf16.mxu0 %v1860_v6  ;;  %v1701_v42 = vpack.c.bf16 %v1136_v38, %v1135_v58 }
 0x219   :  { %v1063_v35 = vmul.f32 %v987_v32, %v810_v27 }
 0x21b   :  { %1279 = vmatprep.mubr.f32.mxu1 %v1063_v35  ;;  %1696 = vmatpush3.bf16.msra.mxu0 %v1695_v29 }
 0x21c   :  { %1280 = vmatmul.mubr.f32.vlgmr.msra.gmra.mrb[14].mxu1 %v1062_v31  ;;  %1697 = vmatprep.subr.bf16.mxu0 %v1860_v6 }
 0x21d   :  { %v1056_v39 = vpop.f32.mrb[12].mxu1 }
 0x21e   :  { %v1064_v40 = vmul.f32 %v1056_v39, %v811_v37  ;;  %v1580_v41 = vpop.f32.mrb[13].mxu1 }
 0x21f   :  { %1699 = vmatpush3.bf16.msra.mxu0 %v1698_v36 }
 0x220   :  { %1700 = vmatprep.subr.bf16.mxu0 %v1860_v6 }
 0x223   :  { %1702 = vmatpush3.bf16.msra.mxu0 %v1701_v42 }
 0x224   :  { %1703 = vmatprep.subr.bf16.mxu0 %v1860_v6 }
 0x227   :  { %1705 = vmatpush3.bf16.msra.mxu0 %v1704_v45 }
 0x228   :  { %1706 = vmatprep.subr.bf16.mxu0 %v1860_v6 }
 0x22b   :  { %1708 = vmatpush3.bf16.msra.mxu0 %v1707_v48 }
 0x22c   :  { %1709 = vmatprep.subr.bf16.mxu0 %v1860_v6 }
 0x22f   :  { %1711 = vmatpush3.bf16.msra.mxu0 %v1710_v51 }
 0x230   :  { %1712 = vmatprep.subr.bf16.mxu0 %v1860_v6  ;;  %v313_v6 = vrot.slane %v2463_v59, %v312_v8 }
 0x232   :  { %v803_v11 = vadd.f32 %v2472_v0, %v313_v6 }
 0x233   :  { %1714 = vmatpush3.bf16.msra.mxu0 %v1713_v54 }
 0x234   :  { %v812_v12 = vand.u32 2147483647, %v803_v11 }
 0x236   :  { %1614 = vmatmul.mubr.f32.vlgmr.msra.gmra.mrb[10].mxu0 %v1064_v40 }
 0x2e9   :  { %v1517_v55 = vpop.f32.mrb[8].mxu0 }
 0x2ea   :  { %v1518_v56 = vpop.f32.mrb[9].mxu0 }
 0x2eb   :  { %v1519_v57 = vadd.f32 %v1518_v56, %v1517_v55 }
 0x2ed   :  { %v1212_v62 = vadd.f32 %v1519_v57, %v2133_v17 }
 0x2ef   :  { %v1552_v60 = vpop.f32.mrb[14].mxu1 }
 0x2f0   :  { %v1553_v61 = vpop.f32.mrb[15].mxu1 }
 0x2f1   :  { %v1554_v63 = vadd.f32 %v1553_v61, %v1552_v60 }
 0x2f3   :  { %v1282_v1 = vadd.f32 %v1554_v63, %v1212_v62 }
 0x309   :  { %v1351_v2 = vpop.f32.mrb[10].mxu0 }
 0x30a   :  { %v1352_v3 = vadd.f32 %v1351_v2, %v1282_v1  ;;  %v1615_v4 = vpop.f32.mrb[11].mxu0 }
 0x30c   :  { %v1355_v5 = vmin.f32 %v1352_v3, 0.0  ;;  %vm1359_vm5 = vcmp.gt.f32.partialorder %v1352_v3, 0.0 }
 0x30e   :  { %v1356_v7 = vmul.f32 1.442695, %v1355_v5 }
 0x310   :  { %1857 = vpow2.f32 %v1356_v7 }
 0x31a   :  { %v1858_v9 = vpop.eup %1857 }
 0x31b   :  { %v1480_v13 = vadd.f32 -1.0, %v1858_v9 }
 0x31d   :  { %v1360_v14 = vsel %vm1359_vm5, %v1352_v3, %v1480_v13 }
 0x31e   :  { %v1361_v17 = vmul.f32 %v1360_v14, %v812_v12 }
 0x320   :  { %v1362_v15 = vsel %vm167_vm0, %v1361_v17, 0.0 }
 0x321   :  { %1363 = vadd.xlane.f32.xlu0 %v1362_v15 }
 0x3ae   :  { %v1364_v16 = vpop.xlane.xlu0 %1363 }
 0x3af   :  { %v1365_v18 = vadd.f32 %v1364_v16, %v803_v11 }
 0x3b1   :  { %1367 = vrot.lane.b32.xlu0 %v1365_v18, %s1862_s7 }
 0x423   :  { %v1368_v10 = vpop.permute.xlu0 %1367 }
 0x424   :  { %1371 = vst.msk [vmem:[%s2552_s8] sm:$0xff] %vm1370_vm6, %v1368_v10 }

</bundles_post_ra>
